<compile_context>
chip_gen: v7x
topology: tpu7x:2x2x1
jax: 0.10.0
libtpu: 0.0.40
codegen_flags: <defaults>
</compile_context>

<pallas_src>
import math

import jax
import jax.numpy as jnp
from jax.experimental import pallas as pl
from jax.experimental.pallas import tpu as pltpu


# ---------------------------------------------------------------------------
# Helpers
# ---------------------------------------------------------------------------

def _pick_tile(n, target):
    """Largest multiple-of-8 divisor of n that is <= target, else n itself."""
    if n <= target:
        return n
    for t in range(target, 7, -1):
        if n % t == 0 and t % 8 == 0:
            return t
    return n


# ---------------------------------------------------------------------------
# Linear kernel: out = x @ W + b   (W pre-transposed to (in, out), bf16)
# ---------------------------------------------------------------------------

def _linear_kernel(x_ref, w_ref, b_ref, o_ref):
    # x_ref: (1, ts, Din)  w_ref: (Din, Dout) bf16  b_ref: (1, Dout) f32
    x = x_ref[0].astype(jnp.bfloat16)                       # bf16 -> native MXU path
    acc = jnp.dot(x, w_ref[...], preferred_element_type=jnp.float32) + b_ref[...]
    o_ref[0] = acc.astype(o_ref.dtype)


def linear(x, w_t, b, *, out_dtype, seq_tile=256):
    """x: (B, S, Din) -> (B, S, Dout).  w_t: (Din, Dout) bf16, b: (1, Dout) f32."""
    B, S, Din = x.shape
    Dout = w_t.shape[1]
    ts = _pick_tile(S, seq_tile)
    grid = (B, S // ts)
    # NOTE: the weight/bias BlockSpecs have a constant index_map; for very large
    # D consider pl.Buffered(1) (or a VMEM-scratch preload) to avoid keeping two
    # copies of the weights resident in VMEM.
    return pl.pallas_call(
        _linear_kernel,
        out_shape=jax.ShapeDtypeStruct((B, S, Dout), out_dtype),
        grid_spec=pltpu.PrefetchScalarGridSpec(
            num_scalar_prefetch=0,
            grid=grid,
            in_specs=[
                pl.BlockSpec((1, ts, Din), lambda bb, ss: (bb, ss, 0)),
                pl.BlockSpec((Din, Dout), lambda bb, ss: (0, 0)),
                pl.BlockSpec((1, Dout), lambda bb, ss: (0, 0)),
            ],
            out_specs=pl.BlockSpec((1, ts, Dout), lambda bb, ss: (bb, ss, 0)),
        ),
        compiler_params=pltpu.CompilerParams(
            dimension_semantics=("parallel", "parallel"),
            vmem_limit_bytes=32 * 1024 * 1024,
        ),
    )(x, w_t, b)


# ---------------------------------------------------------------------------
# Flash attention kernel (online softmax, deferred normalization)
#   q/k/v: (B*H, S, Dh) bf16, q already carries the 1/sqrt(Dh) scale.
# ---------------------------------------------------------------------------

def _flash_kernel(q_ref, k_ref, v_ref, o_ref, m_sc, l_sc, acc_sc):
    kv = pl.program_id(2)

    @pl.when(kv == 0)
    def _():
        m_sc[...] = jnp.full(m_sc.shape, -jnp.inf, jnp.float32)
        l_sc[...] = jnp.zeros(l_sc.shape, jnp.float32)
        acc_sc[...] = jnp.zeros(acc_sc.shape, jnp.float32)

    # scores in f32; bf16 operands hit the native MXU path.
    s = jnp.einsum("bqd,bkd->bqk", q_ref[...], k_ref[...],
                   preferred_element_type=jnp.float32)       # (1, tq, tkv)

    m_prev = m_sc[...]
    m_new = jnp.maximum(m_prev, s.max(-1, keepdims=True))
    alpha = jnp.exp(m_prev - m_new)                           # EUP
    p = jnp.exp(s - m_new)                                    # f32, unnormalized

    l_sc[...] = alpha * l_sc[...] + p.sum(-1, keepdims=True)
    acc_sc[...] = alpha * acc_sc[...] + jnp.einsum(
        "bqk,bkd->bqd", p.astype(v_ref.dtype), v_ref[...],
        preferred_element_type=jnp.float32)
    m_sc[...] = m_new

    @pl.when(kv == pl.num_programs(2) - 1)
    def _():
        # Deferred softmax normalization: one (tq, Dh) multiply + EUP reciprocal.
        inv_l = pl.reciprocal(l_sc[...], approx=True)
        o_ref[...] = (acc_sc[...] * inv_l).astype(o_ref.dtype)


def flash_attention(q, k, v, *, q_tile=256, kv_tile=256):
    """q/k/v: (BH, S, Dh) bf16 (q pre-scaled). Returns (BH, S, Dh) bf16."""
    BH, S, Dh = q.shape
    tq = _pick_tile(S, q_tile)
    tkv = _pick_tile(S, kv_tile)
    grid = (BH, S // tq, S // tkv)
    return pl.pallas_call(
        _flash_kernel,
        out_shape=jax.ShapeDtypeStruct((BH, S, Dh), jnp.bfloat16),
        grid_spec=pltpu.PrefetchScalarGridSpec(
            num_scalar_prefetch=0,
            grid=grid,
            in_specs=[
                pl.BlockSpec((1, tq, Dh), lambda b, qi, ki: (b, qi, 0)),
                pl.BlockSpec((1, tkv, Dh), lambda b, qi, ki: (b, ki, 0)),
                pl.BlockSpec((1, tkv, Dh), lambda b, qi, ki: (b, ki, 0)),
            ],
            out_specs=pl.BlockSpec((1, tq, Dh), lambda b, qi, ki: (b, qi, 0)),
            scratch_shapes=[
                pltpu.VMEM((1, tq, 1), jnp.float32),   # running max m
                pltpu.VMEM((1, tq, 1), jnp.float32),   # running sum l
                pltpu.VMEM((1, tq, Dh), jnp.float32),  # unnormalized accumulator
            ],
        ),
        compiler_params=pltpu.CompilerParams(
            dimension_semantics=("parallel", "parallel", "arbitrary"),
            vmem_limit_bytes=32 * 1024 * 1024,
        ),
    )(q, k, v)


# ---------------------------------------------------------------------------
# Parameter preparation + full forward
# ---------------------------------------------------------------------------

def prepare_params(params, n_head, n_dim):
    """Done ONCE: transpose weights to (in, out), cast to bf16, fold the
    1/sqrt(n_dim) attention scale into the Q projection."""
    d_model = n_head * n_dim
    scale = 1.0 / math.sqrt(n_dim)
    return {
        "wq": (params["wq"].T * scale).astype(jnp.bfloat16),
        "bq": (params["bq"] * scale).reshape(1, d_model).astype(jnp.float32),
        "wk": params["wk"].T.astype(jnp.bfloat16),
        "bk": params["bk"].reshape(1, d_model).astype(jnp.float32),
        "wv": params["wv"].T.astype(jnp.bfloat16),
        "bv": params["bv"].reshape(1, d_model).astype(jnp.float32),
        "wo": params["wo"].T.astype(jnp.bfloat16),
        "bo": params["bo"].reshape(1, d_model).astype(jnp.float32),
    }


def multi_head_attention(query, key, value, prepared, n_head, n_dim):
    """query/key/value: (B, S, d_model) f32. Returns (B, S, d_model) f32.
    Equivalent to the PyTorch module's forward with masking=False."""
    B, S, D = query.shape
    assert D == n_head * n_dim

    # Q/K/V projections (Pallas linear kernel, bf16 MXU, f32 accumulation).
    Q = linear(query, prepared["wq"], prepared["bq"], out_dtype=jnp.bfloat16)
    K = linear(key, prepared["wk"], prepared["bk"], out_dtype=jnp.bfloat16)
    V = linear(value, prepared["wv"], prepared["bv"], out_dtype=jnp.bfloat16)

    # Head split is plain XLA layout glue (outside the kernels) so no in-kernel
    # lane-axis slicing / concatenation is needed.
    def split_heads(x):
        return (x.reshape(B, S, n_head, n_dim)
                 .transpose(0, 2, 1, 3)
                 .reshape(B * n_head, S, n_dim))

    ctx = flash_attention(split_heads(Q), split_heads(K), split_heads(V))

    # Merge heads back to a lane-dense (B, S, D) slab for the output projection.
    ctx = (ctx.reshape(B, n_head, S, n_dim)
              .transpose(0, 2, 1, 3)
              .reshape(B, S, D))

    return linear(ctx, prepared["wo"], prepared["bo"], out_dtype=jnp.float32)


# ---------------------------------------------------------------------------
# Pure-JAX f32 reference mirroring the PyTorch forward (masking=False)
# ---------------------------------------------------------------------------

def reference_mha(query, key, value, params, n_head, n_dim):
    B, S, D = query.shape
    Q = query @ params["wq"].T + params["bq"]
    K = key @ params["wk"].T + params["bk"]
    V = value @ params["wv"].T + params["bv"]
    Qh = Q.reshape(B, S, n_head, n_dim).transpose(0, 2, 1, 3)
    Kh = K.reshape(B, S, n_head, n_dim).transpose(0, 2, 1, 3)
    Vh = V.reshape(B, S, n_head, n_dim).transpose(0, 2, 1, 3)
    scores = jnp.einsum("bhqd,bhkd->bhqk", Qh, Kh) / math.sqrt(n_dim)
    attn = jax.nn.softmax(scores, axis=-1)
    ctx = jnp.einsum("bhqk,bhkd->bhqd", attn, Vh)
    ctx = ctx.transpose(0, 2, 1, 3).reshape(B, S, D)
    return ctx @ params["wo"].T + params["bo"]


# ---------------------------------------------------------------------------
# Demo / correctness check
# ---------------------------------------------------------------------------

if __name__ == "__main__":
    # Small shapes consistent with the module: d_model = n_head * n_dim.
    # (Note: d_model=32 is lane-sparse; real configs should use d_model that is
    #  a multiple of 128 for lane-dense stores.)
    batch, seq, n_head, n_dim = 2, 8, 4, 8
    d_model = n_head * n_dim  # 32

    key0 = jax.random.PRNGKey(0)
    ks = jax.random.split(key0, 11)

    def init_linear(kw, kb, out_f, in_f):
        bound = 1.0 / math.sqrt(in_f)
        w = jax.random.uniform(kw, (out_f, in_f), jnp.float32, -bound, bound)
        b = jax.random.uniform(kb, (out_f,), jnp.float32, -bound, bound)
        return w, b

    wq, bq = init_linear(ks[0], ks[1], d_model, d_model)
    wk, bk = init_linear(ks[2], ks[3], d_model, d_model)
    wv, bv = init_linear(ks[4], ks[5], d_model, d_model)
    wo, bo = init_linear(ks[6], ks[7], d_model, d_model)
    params = {"wq": wq, "bq": bq, "wk": wk, "bk": bk,
              "wv": wv, "bv": bv, "wo": wo, "bo": bo}

    query = jax.random.normal(ks[8], (batch, seq, d_model), jnp.float32)
    key_in = jax.random.normal(ks[9], (batch, seq, d_model), jnp.float32)
    value = jax.random.normal(ks[10], (batch, seq, d_model), jnp.float32)

    prepared = prepare_params(params, n_head, n_dim)

    mha = jax.jit(multi_head_attention, static_argnums=(4, 5))
    out = mha(query, key_in, value, prepared, n_head, n_dim)
    out = jax.block_until_ready(out)

    ref = reference_mha(query, key_in, value, params, n_head, n_dim)
    assert out.shape == (batch, seq, d_model)
    # bf16 MXU inputs + approx reciprocal -> tolerance loosened vs the f32 ref.
    assert jnp.allclose(out, ref, atol=5e-2, rtol=5e-2), (
        "mismatch vs reference, max abs err = "
        + str(float(jnp.max(jnp.abs(out - ref)))))

    print("KERNEL_OK")
</pallas_src>

<mosaic_0001>
module attributes {stable_mosaic.version = 11 : i64} {
  func.func @_linear_kernel(%arg0: i32, %arg1: i32, %arg2: memref<1x8x32xf32, #tpu.memory_space<vmem>>, %arg3: memref<32x32xbf16, #tpu.memory_space<vmem>>, %arg4: memref<1x32xf32, #tpu.memory_space<vmem>>, %arg5: memref<1x8x32xbf16, #tpu.memory_space<vmem>>) attributes {dimension_semantics = [#tpu.dimension_semantics<parallel>, #tpu.dimension_semantics<parallel>], iteration_bounds = array<i64: 2, 1>, scalar_prefetch = 0 : i64, scratch_operands = 0 : i64, tpu.core_type = #tpu.core_type<tc>, window_params = [{transform_indices = @transform_0, window_bounds = array<i64: 1, 8, 32>}, {pipeline_mode = #tpu.pipeline_mode<synchronous>, transform_indices = @transform_1, window_bounds = array<i64: 32, 32>}, {pipeline_mode = #tpu.pipeline_mode<synchronous>, transform_indices = @transform_2, window_bounds = array<i64: 1, 32>}, {transform_indices = @transform_3, window_bounds = array<i64: 1, 8, 32>}]} {
    %c0 = arith.constant 0 : index
    %c0_0 = arith.constant 0 : index
    %c0_1 = arith.constant 0 : index
    %0 = vector.load %arg2[%c0, %c0_0, %c0_1] : memref<1x8x32xf32, #tpu.memory_space<vmem>>, vector<1x8x32xf32>
    %1 = vector.shape_cast %0 : vector<1x8x32xf32> to vector<8x32xf32>
    %2 = arith.truncf %1 : vector<8x32xf32> to vector<8x32xbf16>
    %c0_2 = arith.constant 0 : index
    %c0_3 = arith.constant 0 : index
    %3 = vector.load %arg3[%c0_2, %c0_3] : memref<32x32xbf16, #tpu.memory_space<vmem>>, vector<32x32xbf16>
    %cst = arith.constant dense<0.000000e+00> : vector<8x32xf32>
    %4 = tpu.matmul %2, %3, %cst {dimension_numbers = #tpu.dot_dimension_numbers<[1], [0], [0], [1], [0, 0, 1, 1], [], []>} : vector<8x32xbf16>, vector<32x32xbf16>, vector<8x32xf32> -> vector<8x32xf32>
    %c0_4 = arith.constant 0 : index
    %c0_5 = arith.constant 0 : index
    %5 = vector.load %arg4[%c0_4, %c0_5] : memref<1x32xf32, #tpu.memory_space<vmem>>, vector<1x32xf32>
    %6 = vector.broadcast %5 : vector<1x32xf32> to vector<8x32xf32>
    %7 = arith.addf %4, %6 : vector<8x32xf32>
    %8 = arith.truncf %7 : vector<8x32xf32> to vector<8x32xbf16>
    %c0_6 = arith.constant 0 : index
    %c0_7 = arith.constant 0 : index
    %c0_8 = arith.constant 0 : index
    %9 = vector.load %arg5[%c0_6, %c0_7, %c0_8] : memref<1x8x32xbf16, #tpu.memory_space<vmem>>, vector<1x8x32xbf16>
    %10 = vector.shape_cast %9 : vector<1x8x32xbf16> to vector<8x32xbf16>
    %11 = vector.shape_cast %8 : vector<8x32xbf16> to vector<1x8x32xbf16>
    tpu.vector_store %arg5[%c0_6, %c0_7, %c0_8], %11 {strides = array<i32>} : memref<1x8x32xbf16, #tpu.memory_space<vmem>>, vector<1x8x32xbf16>,
    return
  }
  func.func @transform_0(%arg0: i32, %arg1: i32) -> (i32, i32, i32) {
    %c0_i32 = arith.constant 0 : i32
    %c0_i32_0 = arith.constant 0 : i32
    return %arg0, %arg1, %c0_i32 : i32, i32, i32
  }
  func.func @transform_1(%arg0: i32, %arg1: i32) -> (i32, i32) {
    %c0_i32 = arith.constant 0 : i32
    %c0_i32_0 = arith.constant 0 : i32
    %c0_i32_1 = arith.constant 0 : i32
    return %c0_i32, %c0_i32_0 : i32, i32
  }
  func.func @transform_2(%arg0: i32, %arg1: i32) -> (i32, i32) {
    %c0_i32 = arith.constant 0 : i32
    %c0_i32_0 = arith.constant 0 : i32
    %c0_i32_1 = arith.constant 0 : i32
    return %c0_i32, %c0_i32_0 : i32, i32
  }
  func.func @transform_3(%arg0: i32, %arg1: i32) -> (i32, i32, i32) {
    %c0_i32 = arith.constant 0 : i32
    %c0_i32_0 = arith.constant 0 : i32
    return %arg0, %arg1, %c0_i32 : i32, i32, i32
  }
}

module attributes {stable_mosaic.version = 11 : i64} {
  func.func @_linear_kernel(%arg0: i32, %arg1: i32, %arg2: memref<1x8x32xf32, #tpu.memory_space<vmem>>, %arg3: memref<32x32xbf16, #tpu.memory_space<vmem>>, %arg4: memref<1x32xf32, #tpu.memory_space<vmem>>, %arg5: memref<1x8x32xbf16, #tpu.memory_space<vmem>>) attributes {dimension_semantics = [#tpu.dimension_semantics<parallel>, #tpu.dimension_semantics<parallel>], iteration_bounds = array<i64: 2, 1>, scalar_prefetch = 0 : i64, scratch_operands = 0 : i64, tpu.core_type = #tpu.core_type<tc>, window_params = [{transform_indices = @transform_0, window_bounds = array<i64: 1, 8, 32>}, {pipeline_mode = #tpu.pipeline_mode<synchronous>, transform_indices = @transform_1, window_bounds = array<i64: 32, 32>}, {pipeline_mode = #tpu.pipeline_mode<synchronous>, transform_indices = @transform_2, window_bounds = array<i64: 1, 32>}, {transform_indices = @transform_3, window_bounds = array<i64: 1, 8, 32>}]} {
    %c0 = arith.constant 0 : index
    %c0_0 = arith.constant 0 : index
    %c0_1 = arith.constant 0 : index
    %0 = vector.load %arg2[%c0, %c0_0, %c0_1] : memref<1x8x32xf32, #tpu.memory_space<vmem>>, vector<1x8x32xf32>
    %1 = vector.shape_cast %0 : vector<1x8x32xf32> to vector<8x32xf32>
    %2 = arith.truncf %1 : vector<8x32xf32> to vector<8x32xbf16>
    %c0_2 = arith.constant 0 : index
    %c0_3 = arith.constant 0 : index
    %3 = vector.load %arg3[%c0_2, %c0_3] : memref<32x32xbf16, #tpu.memory_space<vmem>>, vector<32x32xbf16>
    %cst = arith.constant dense<0.000000e+00> : vector<8x32xf32>
    %4 = tpu.matmul %2, %3, %cst {dimension_numbers = #tpu.dot_dimension_numbers<[1], [0], [0], [1], [0, 0, 1, 1], [], []>} : vector<8x32xbf16>, vector<32x32xbf16>, vector<8x32xf32> -> vector<8x32xf32>
    %c0_4 = arith.constant 0 : index
    %c0_5 = arith.constant 0 : index
    %5 = vector.load %arg4[%c0_4, %c0_5] : memref<1x32xf32, #tpu.memory_space<vmem>>, vector<1x32xf32>
    %6 = vector.broadcast %5 : vector<1x32xf32> to vector<8x32xf32>
    %7 = arith.addf %4, %6 : vector<8x32xf32>
    %8 = arith.truncf %7 : vector<8x32xf32> to vector<8x32xbf16>
    %c0_6 = arith.constant 0 : index
    %c0_7 = arith.constant 0 : index
    %c0_8 = arith.constant 0 : index
    %9 = vector.load %arg5[%c0_6, %c0_7, %c0_8] : memref<1x8x32xbf16, #tpu.memory_space<vmem>>, vector<1x8x32xbf16>
    %10 = vector.shape_cast %9 : vector<1x8x32xbf16> to vector<8x32xbf16>
    %11 = vector.shape_cast %8 : vector<8x32xbf16> to vector<1x8x32xbf16>
    tpu.vector_store %arg5[%c0_6, %c0_7, %c0_8], %11 {strides = array<i32>} : memref<1x8x32xbf16, #tpu.memory_space<vmem>>, vector<1x8x32xbf16>,
    return
  }
  func.func @transform_0(%arg0: i32, %arg1: i32) -> (i32, i32, i32) {
    %c0_i32 = arith.constant 0 : i32
    %c0_i32_0 = arith.constant 0 : i32
    return %arg0, %arg1, %c0_i32 : i32, i32, i32
  }
  func.func @transform_1(%arg0: i32, %arg1: i32) -> (i32, i32) {
    %c0_i32 = arith.constant 0 : i32
    %c0_i32_0 = arith.constant 0 : i32
    %c0_i32_1 = arith.constant 0 : i32
    return %c0_i32, %c0_i32_0 : i32, i32
  }
  func.func @transform_2(%arg0: i32, %arg1: i32) -> (i32, i32) {
    %c0_i32 = arith.constant 0 : i32
    %c0_i32_0 = arith.constant 0 : i32
    %c0_i32_1 = arith.constant 0 : i32
    return %c0_i32, %c0_i32_0 : i32, i32
  }
  func.func @transform_3(%arg0: i32, %arg1: i32) -> (i32, i32, i32) {
    %c0_i32 = arith.constant 0 : i32
    %c0_i32_0 = arith.constant 0 : i32
    return %arg0, %arg1, %c0_i32 : i32, i32, i32
  }
}

module attributes {stable_mosaic.version = 11 : i64} {
  func.func @_flash_kernel(%arg0: i32, %arg1: i32, %arg2: i32, %arg3: memref<1x8x8xbf16, #tpu.memory_space<vmem>>, %arg4: memref<1x8x8xbf16, #tpu.memory_space<vmem>>, %arg5: memref<1x8x8xbf16, #tpu.memory_space<vmem>>, %arg6: memref<1x8x8xbf16, #tpu.memory_space<vmem>>, %arg7: memref<1x8x1xf32, #tpu.memory_space<vmem>>, %arg8: memref<1x8x1xf32, #tpu.memory_space<vmem>>, %arg9: memref<1x8x8xf32, #tpu.memory_space<vmem>>) attributes {dimension_semantics = [#tpu.dimension_semantics<parallel>, #tpu.dimension_semantics<parallel>, #tpu.dimension_semantics<arbitrary>], iteration_bounds = array<i64: 8, 1, 1>, scalar_prefetch = 0 : i64, scratch_operands = 3 : i64, tpu.core_type = #tpu.core_type<tc>, window_params = [{transform_indices = @transform_0, window_bounds = array<i64: 1, 8, 8>}, {transform_indices = @transform_1, window_bounds = array<i64: 1, 8, 8>}, {transform_indices = @transform_2, window_bounds = array<i64: 1, 8, 8>}, {transform_indices = @transform_3, window_bounds = array<i64: 1, 8, 8>}]} {
    %c0_i32 = arith.constant 0 : i32
    %0 = arith.cmpi eq, %arg2, %c0_i32 : i32
    %1 = arith.extui %0 : i1 to i32
    %c0_i32_0 = arith.constant 0 : i32
    %2 = arith.cmpi ne, %1, %c0_i32_0 : i32
    scf.if %2 {
      %cst_32 = arith.constant 0xFF800000 : f32
      %33 = vector.broadcast %cst_32 : f32 to vector<1x8x1xf32>
      %c0_33 = arith.constant 0 : index
      %c0_34 = arith.constant 0 : index
      %c0_35 = arith.constant 0 : index
      %34 = vector.load %arg7[%c0_33, %c0_34, %c0_35] : memref<1x8x1xf32, #tpu.memory_space<vmem>>, vector<1x8x1xf32>
      tpu.vector_store %arg7[%c0_33, %c0_34, %c0_35], %33 {strides = array<i32>} : memref<1x8x1xf32, #tpu.memory_space<vmem>>, vector<1x8x1xf32>,
      %cst_36 = arith.constant 0.000000e+00 : f32
      %35 = vector.broadcast %cst_36 : f32 to vector<1x8x1xf32>
      %c0_37 = arith.constant 0 : index
      %c0_38 = arith.constant 0 : index
      %c0_39 = arith.constant 0 : index
      %36 = vector.load %arg8[%c0_37, %c0_38, %c0_39] : memref<1x8x1xf32, #tpu.memory_space<vmem>>, vector<1x8x1xf32>
      tpu.vector_store %arg8[%c0_37, %c0_38, %c0_39], %35 {strides = array<i32>} : memref<1x8x1xf32, #tpu.memory_space<vmem>>, vector<1x8x1xf32>,
      %cst_40 = arith.constant 0.000000e+00 : f32
      %37 = vector.broadcast %cst_40 : f32 to vector<1x8x8xf32>
      %c0_41 = arith.constant 0 : index
      %c0_42 = arith.constant 0 : index
      %c0_43 = arith.constant 0 : index
      %38 = vector.load %arg9[%c0_41, %c0_42, %c0_43] : memref<1x8x8xf32, #tpu.memory_space<vmem>>, vector<1x8x8xf32>
      tpu.vector_store %arg9[%c0_41, %c0_42, %c0_43], %37 {strides = array<i32>} : memref<1x8x8xf32, #tpu.memory_space<vmem>>, vector<1x8x8xf32>,
    } else {
    }
    %c0 = arith.constant 0 : index
    %c0_1 = arith.constant 0 : index
    %c0_2 = arith.constant 0 : index
    %3 = vector.load %arg3[%c0, %c0_1, %c0_2] : memref<1x8x8xbf16, #tpu.memory_space<vmem>>, vector<1x8x8xbf16>
    %c0_3 = arith.constant 0 : index
    %c0_4 = arith.constant 0 : index
    %c0_5 = arith.constant 0 : index
    %4 = vector.load %arg4[%c0_3, %c0_4, %c0_5] : memref<1x8x8xbf16, #tpu.memory_space<vmem>>, vector<1x8x8xbf16>
    "tpu.trace_start"() <{level = 10 : i32, message = "bqd,bkd->bqk"}> : () -> ()
    %cst = arith.constant dense<0.000000e+00> : vector<1x8x8xf32>
    %5 = tpu.matmul %3, %4, %cst {dimension_numbers = #tpu.dot_dimension_numbers<[2], [2], [1], [1], [0, 0, 0, 1, 1, 1], [0], [0]>} : vector<1x8x8xbf16>, vector<1x8x8xbf16>, vector<1x8x8xf32> -> vector<1x8x8xf32>
    "tpu.trace_stop"() : () -> ()
    %c0_6 = arith.constant 0 : index
    %c0_7 = arith.constant 0 : index
    %c0_8 = arith.constant 0 : index
    %6 = vector.load %arg7[%c0_6, %c0_7, %c0_8] : memref<1x8x1xf32, #tpu.memory_space<vmem>>, vector<1x8x1xf32>
    %cst_9 = arith.constant dense<0xFF800000> : vector<1x8xf32>
    %7 = vector.multi_reduction <maximumf>, %5, %cst_9 [2] : vector<1x8x8xf32> to vector<1x8xf32>
    %8 = vector.shape_cast %7 : vector<1x8xf32> to vector<1x8x1xf32>
    %9 = arith.maximumf %6, %8 : vector<1x8x1xf32>
    %10 = arith.subf %6, %9 : vector<1x8x1xf32>
    %11 = math.exp %10 : vector<1x8x1xf32>
    %12 = vector.broadcast %9 : vector<1x8x1xf32> to vector<1x8x8xf32>
    %13 = arith.subf %5, %12 : vector<1x8x8xf32>
    %14 = math.exp %13 : vector<1x8x8xf32>
    %c0_10 = arith.constant 0 : index
    %c0_11 = arith.constant 0 : index
    %c0_12 = arith.constant 0 : index
    %15 = vector.load %arg8[%c0_10, %c0_11, %c0_12] : memref<1x8x1xf32, #tpu.memory_space<vmem>>, vector<1x8x1xf32>
    %16 = arith.mulf %11, %15 : vector<1x8x1xf32>
    %cst_13 = arith.constant dense<0.000000e+00> : vector<1x8xf32>
    %17 = vector.multi_reduction <add>, %14, %cst_13 [2] : vector<1x8x8xf32> to vector<1x8xf32>
    %18 = vector.shape_cast %17 : vector<1x8xf32> to vector<1x8x1xf32>
    %19 = arith.addf %16, %18 : vector<1x8x1xf32>
    %c0_14 = arith.constant 0 : index
    %c0_15 = arith.constant 0 : index
    %c0_16 = arith.constant 0 : index
    %20 = vector.load %arg8[%c0_14, %c0_15, %c0_16] : memref<1x8x1xf32, #tpu.memory_space<vmem>>, vector<1x8x1xf32>
    tpu.vector_store %arg8[%c0_14, %c0_15, %c0_16], %19 {strides = array<i32>} : memref<1x8x1xf32, #tpu.memory_space<vmem>>, vector<1x8x1xf32>,
    %c0_17 = arith.constant 0 : index
    %c0_18 = arith.constant 0 : index
    %c0_19 = arith.constant 0 : index
    %21 = vector.load %arg9[%c0_17, %c0_18, %c0_19] : memref<1x8x8xf32, #tpu.memory_space<vmem>>, vector<1x8x8xf32>
    %22 = vector.broadcast %11 : vector<1x8x1xf32> to vector<1x8x8xf32>
    %23 = arith.mulf %22, %21 : vector<1x8x8xf32>
    %24 = arith.truncf %14 : vector<1x8x8xf32> to vector<1x8x8xbf16>
    %c0_20 = arith.constant 0 : index
    %c0_21 = arith.constant 0 : index
    %c0_22 = arith.constant 0 : index
    %25 = vector.load %arg5[%c0_20, %c0_21, %c0_22] : memref<1x8x8xbf16, #tpu.memory_space<vmem>>, vector<1x8x8xbf16>
    "tpu.trace_start"() <{level = 10 : i32, message = "bqk,bkd->bqd"}> : () -> ()
    %cst_23 = arith.constant dense<0.000000e+00> : vector<1x8x8xf32>
    %26 = tpu.matmul %24, %25, %cst_23 {dimension_numbers = #tpu.dot_dimension_numbers<[2], [1], [1], [2], [0, 0, 0, 1, 1, 2], [0], [0]>} : vector<1x8x8xbf16>, vector<1x8x8xbf16>, vector<1x8x8xf32> -> vector<1x8x8xf32>
    "tpu.trace_stop"() : () -> ()
    %27 = arith.addf %23, %26 : vector<1x8x8xf32>
    %c0_24 = arith.constant 0 : index
    %c0_25 = arith.constant 0 : index
    %c0_26 = arith.constant 0 : index
    %28 = vector.load %arg9[%c0_24, %c0_25, %c0_26] : memref<1x8x8xf32, #tpu.memory_space<vmem>>, vector<1x8x8xf32>
    tpu.vector_store %arg9[%c0_24, %c0_25, %c0_26], %27 {strides = array<i32>} : memref<1x8x8xf32, #tpu.memory_space<vmem>>, vector<1x8x8xf32>,
    %c0_27 = arith.constant 0 : index
    %c0_28 = arith.constant 0 : index
    %c0_29 = arith.constant 0 : index
    %29 = vector.load %arg7[%c0_27, %c0_28, %c0_29] : memref<1x8x1xf32, #tpu.memory_space<vmem>>, vector<1x8x1xf32>
    tpu.vector_store %arg7[%c0_27, %c0_28, %c0_29], %9 {strides = array<i32>} : memref<1x8x1xf32, #tpu.memory_space<vmem>>, vector<1x8x1xf32>,
    %c0_i32_30 = arith.constant 0 : i32
    %30 = arith.cmpi eq, %arg2, %c0_i32_30 : i32
    %31 = arith.extui %30 : i1 to i32
    %c0_i32_31 = arith.constant 0 : i32
    %32 = arith.cmpi ne, %31, %c0_i32_31 : i32
    scf.if %32 {
      %c0_32 = arith.constant 0 : index
      %c0_33 = arith.constant 0 : index
      %c0_34 = arith.constant 0 : index
      %33 = vector.load %arg8[%c0_32, %c0_33, %c0_34] : memref<1x8x1xf32, #tpu.memory_space<vmem>>, vector<1x8x1xf32>
      %34 = tpu.reciprocal %33 {approx = true} : vector<1x8x1xf32> -> vector<1x8x1xf32>
      %c0_35 = arith.constant 0 : index
      %c0_36 = arith.constant 0 : index
      %c0_37 = arith.constant 0 : index
      %35 = vector.load %arg9[%c0_35, %c0_36, %c0_37] : memref<1x8x8xf32, #tpu.memory_space<vmem>>, vector<1x8x8xf32>
      %36 = vector.broadcast %34 : vector<1x8x1xf32> to vector<1x8x8xf32>
      %37 = arith.mulf %35, %36 : vector<1x8x8xf32>
      %38 = arith.truncf %37 : vector<1x8x8xf32> to vector<1x8x8xbf16>
      %c0_38 = arith.constant 0 : index
      %c0_39 = arith.constant 0 : index
      %c0_40 = arith.constant 0 : index
      %39 = vector.load %arg6[%c0_38, %c0_39, %c0_40] : memref<1x8x8xbf16, #tpu.memory_space<vmem>>, vector<1x8x8xbf16>
      tpu.vector_store %arg6[%c0_38, %c0_39, %c0_40], %38 {strides = array<i32>} : memref<1x8x8xbf16, #tpu.memory_space<vmem>>, vector<1x8x8xbf16>,
    } else {
    }
    return
  }
  func.func @transform_0(%arg0: i32, %arg1: i32, %arg2: i32) -> (i32, i32, i32) {
    %c0_i32 = arith.constant 0 : i32
    %c0_i32_0 = arith.constant 0 : i32
    return %arg0, %arg1, %c0_i32 : i32, i32, i32
  }
  func.func @transform_1(%arg0: i32, %arg1: i32, %arg2: i32) -> (i32, i32, i32) {
    %c0_i32 = arith.constant 0 : i32
    %c0_i32_0 = arith.constant 0 : i32
    return %arg0, %arg2, %c0_i32 : i32, i32, i32
  }
  func.func @transform_2(%arg0: i32, %arg1: i32, %arg2: i32) -> (i32, i32, i32) {
    %c0_i32 = arith.constant 0 : i32
    %c0_i32_0 = arith.constant 0 : i32
    return %arg0, %arg2, %c0_i32 : i32, i32, i32
  }
  func.func @transform_3(%arg0: i32, %arg1: i32, %arg2: i32) -> (i32, i32, i32) {
    %c0_i32 = arith.constant 0 : i32
    %c0_i32_0 = arith.constant 0 : i32
    return %arg0, %arg1, %c0_i32 : i32, i32, i32
  }
}

module attributes {stable_mosaic.version = 11 : i64} {
  func.func @_linear_kernel(%arg0: i32, %arg1: i32, %arg2: memref<1x8x32xbf16, #tpu.memory_space<vmem>>, %arg3: memref<32x32xbf16, #tpu.memory_space<vmem>>, %arg4: memref<1x32xf32, #tpu.memory_space<vmem>>, %arg5: memref<1x8x32xf32, #tpu.memory_space<vmem>>) attributes {dimension_semantics = [#tpu.dimension_semantics<parallel>, #tpu.dimension_semantics<parallel>], iteration_bounds = array<i64: 2, 1>, scalar_prefetch = 0 : i64, scratch_operands = 0 : i64, tpu.core_type = #tpu.core_type<tc>, window_params = [{transform_indices = @transform_0, window_bounds = array<i64: 1, 8, 32>}, {pipeline_mode = #tpu.pipeline_mode<synchronous>, transform_indices = @transform_1, window_bounds = array<i64: 32, 32>}, {pipeline_mode = #tpu.pipeline_mode<synchronous>, transform_indices = @transform_2, window_bounds = array<i64: 1, 32>}, {transform_indices = @transform_3, window_bounds = array<i64: 1, 8, 32>}]} {
    %c0 = arith.constant 0 : index
    %c0_0 = arith.constant 0 : index
    %c0_1 = arith.constant 0 : index
    %0 = vector.load %arg2[%c0, %c0_0, %c0_1] : memref<1x8x32xbf16, #tpu.memory_space<vmem>>, vector<1x8x32xbf16>
    %1 = vector.shape_cast %0 : vector<1x8x32xbf16> to vector<8x32xbf16>
    %c0_2 = arith.constant 0 : index
    %c0_3 = arith.constant 0 : index
    %2 = vector.load %arg3[%c0_2, %c0_3] : memref<32x32xbf16, #tpu.memory_space<vmem>>, vector<32x32xbf16>
    %cst = arith.constant dense<0.000000e+00> : vector<8x32xf32>
    %3 = tpu.matmul %1, %2, %cst {dimension_numbers = #tpu.dot_dimension_numbers<[1], [0], [0], [1], [0, 0, 1, 1], [], []>} : vector<8x32xbf16>, vector<32x32xbf16>, vector<8x32xf32> -> vector<8x32xf32>
    %c0_4 = arith.constant 0 : index
    %c0_5 = arith.constant 0 : index
    %4 = vector.load %arg4[%c0_4, %c0_5] : memref<1x32xf32, #tpu.memory_space<vmem>>, vector<1x32xf32>
    %5 = vector.broadcast %4 : vector<1x32xf32> to vector<8x32xf32>
    %6 = arith.addf %3, %5 : vector<8x32xf32>
    %c0_6 = arith.constant 0 : index
    %c0_7 = arith.constant 0 : index
    %c0_8 = arith.constant 0 : index
    %7 = vector.load %arg5[%c0_6, %c0_7, %c0_8] : memref<1x8x32xf32, #tpu.memory_space<vmem>>, vector<1x8x32xf32>
    %8 = vector.shape_cast %7 : vector<1x8x32xf32> to vector<8x32xf32>
    %9 = vector.shape_cast %6 : vector<8x32xf32> to vector<1x8x32xf32>
    tpu.vector_store %arg5[%c0_6, %c0_7, %c0_8], %9 {strides = array<i32>} : memref<1x8x32xf32, #tpu.memory_space<vmem>>, vector<1x8x32xf32>,
    return
  }
  func.func @transform_0(%arg0: i32, %arg1: i32) -> (i32, i32, i32) {
    %c0_i32 = arith.constant 0 : i32
    %c0_i32_0 = arith.constant 0 : i32
    return %arg0, %arg1, %c0_i32 : i32, i32, i32
  }
  func.func @transform_1(%arg0: i32, %arg1: i32) -> (i32, i32) {
    %c0_i32 = arith.constant 0 : i32
    %c0_i32_0 = arith.constant 0 : i32
    %c0_i32_1 = arith.constant 0 : i32
    return %c0_i32, %c0_i32_0 : i32, i32
  }
  func.func @transform_2(%arg0: i32, %arg1: i32) -> (i32, i32) {
    %c0_i32 = arith.constant 0 : i32
    %c0_i32_0 = arith.constant 0 : i32
    %c0_i32_1 = arith.constant 0 : i32
    return %c0_i32, %c0_i32_0 : i32, i32
  }
  func.func @transform_3(%arg0: i32, %arg1: i32) -> (i32, i32, i32) {
    %c0_i32 = arith.constant 0 : i32
    %c0_i32_0 = arith.constant 0 : i32
    return %arg0, %arg1, %c0_i32 : i32, i32, i32
  }
}

</mosaic_0001>

<bundles_post_ra>
// kernel: multi_head_attention.5
= control target key start
LH: loop header
LB: loop body
LE: loop exit
PB: predicated region body
PF: predicated region fallthrough
CT: control target
= control target key end

     0   :  { %8 = vsyncpa [#allocation3], 0  ;;  %s690_s0 = inlined_call_operand.hbm [shape: f32[2,8,32], index: 0, kind: input, shape index: {}]   ;;  %s691_s1 = inlined_call_operand.vmem [shape: bf16[32,32], index: 1, kind: input, shape index: {}]   ;;  %s692_s2 = inlined_call_operand.vmem [shape: f32[1,32], index: 2, kind: input, shape index: {}]   ;;  %s693_s3 = inlined_call_operand.vmem [shape: bf16[2,8,32], index: 3, kind: output, shape index: {}]  }
   0x1   :  { %10 = vsyncpa [#allocation3 + $0x1], 0  ;;  %s556_s12 = smov 0   ;;  %s558_s13 = smov 0  }
   0x2   :  { %s560_s14 = smov 0   ;;  %s562_s15 = smov 0  }
   0x3   :  { %s564_s16 = smov 0   ;;  %s566_s17 = smov 0  }
   0x4 LB: > { %s366_s18 = sadd.s32 4294967295, %s531_s17   ;;  %s28_s19 = sadd.s32 1, %s527_s16  ;;  %s531_s17 = sphi %s566_s17, %s16_s17   ;;  %s527_s16 = sphi %s564_s16, %s703_s16   ;;  %s523_s15 = sphi %s562_s15, %s702_s15   ;;  %s519_s14 = sphi %s560_s14, %s701_s14   ;;  %s515_s13 = sphi %s558_s13, %s700_s13   ;;  %s511_s12 = sphi %s556_s12, %s699_s12  }
   0x5   : > { %p30_p0 = scmp.ge.s32.totalorder %s28_s19, 2  ;;  %s37_s20 = sadd.s32 1, %s519_s14 }
   0x6   : > { %p44_p1 = scmp.ne.s32.totalorder %s519_s14, %s515_s13  ;;  %p45_p2 = scmp.eq.s32.totalorder %s531_s17, 0 }
   0x7   : > { %s705_s19 = smov (%p30_p0, %s28_s19), 0  ;;  %p50_p4 = scmp.ne.s32.totalorder %s515_s13, %s511_s12 }
   0x8   : > { %p592_p3 = por %p45_p2, %p44_p1  ;;  %s32_s22 = ssub.s32 %s527_s16, %s705_s19 }
   0x9   : > { %p51_p5 = scmp.eq.s32.totalorder %s366_s18, 0  ;;  %p35_p6 = scmp.eq.s32.totalorder %s32_s22, 0 }
   0xa   : > { %p398_p8 = scmp.lt.s32.totalorder %s531_s17, 2  ;;  %s150_s25 = sand.u32 1, %s519_s14  }
   0xb   : > { %p599_p7 = por %p51_p5, %p50_p4  ;;  %s371_s26 = sshll.u32 %s527_s16, 7 }
   0xc   : > { %s605_s24 = scalar_select %p35_p6, %s519_s14, %s37_s20  }
   0xd   : > { %s370_s27 = sshll.u32 %s150_s25, 3  ;;  %s612_s30 = scalar_lea.hbm %s690_s0, %s371_s26 }
   0xe   : > { %s154_s4 = scalar_lea.vmem [#allocation2], %s370_s27  ;;  %p616_p9 = pnand %p398_p8, %p592_p3 }
   0xf   : > { %s162_s5 = sshll.u32 %s154_s4, 4  ;;  %s151_s7 = scalar_lea.sflag [#allocation3], %s150_s25  ;;  %s620_s5 = int_to_ptr.vmem [resolvable:$true] %s162_s5 }
  0x10   : > { %s451_s8 = scalar_lea.hbm %s612_s30, 128  ;;  %p453_p13 = pneg %p616_p9 }
  0x11   : > { %p452_p12 = scmp.ne.s32.totalorder %s612_s30, %s451_s8  ;;  %s456_s11 = scalar_lea.hbm %s690_s0, 256 }
  0x12   : > { %p457_p2 = scmp.lt.u32.totalorder %s612_s30, %s690_s0  ;;  %p458_p3 = scmp.lt.u32.totalorder %s456_s11, %s451_s8 }
  0x13   : > { %p454_p0 = pnand %p453_p13, %p452_p12  ;;  %p460_p5 = scmp.lt.u32.totalorder %s451_s8, %s612_s30 }
  0x14   : > { %p459_p4 = por %p458_p3, %p457_p2 }
  0x15   : > { %p455_p1 = pneg %p454_p0 }
  0x16   : > { %p461_p6 = por %p460_p5, %p459_p4 }
  0x18   : > { %p462_p8 = pnand %p461_p6, %p455_p1 }
  0x1a   : > { %465 = shalt.err (!%p462_p8)
}
  0x1b   : > { %s466_s20 = scalar_lea.vmem %s620_s5, 128  ;;  %s533_s21 = smov [#allocation2]  }
  0x1c   : > { %p467_p12 = scmp.ne.s32.totalorder %s620_s5, %s466_s20  ;;  %s471_s22 = sshll.u32 %s533_s21, 4  ;;  %s472_s22 = int_to_ptr.vmem [resolvable:$false] %s471_s22 }
  0x1d   : > { %s473_s25 = scalar_lea.vmem %s472_s22, 256  ;;  %p474_p11 = scmp.lt.s32.totalorder %s620_s5, %s472_s22 }
  0x1e   : > { %p469_p0 = pnand %p467_p12, %p453_p13  ;;  %p475_p2 = scmp.lt.s32.totalorder %s473_s25, %s466_s20 }
  0x20   : > { %p470_p10 = pneg %p469_p0  ;;  %p476_p3 = por %p475_p2, %p474_p11 }
  0x22   : > { %p477_p4 = pnand %p476_p3, %p470_p10 }
  0x24   : > { %480 = shalt.err (!%p477_p4)
}
  0x25   : > { %397 = dma.hbm_to_vmem [thread:$0]  (!%p616_p9), %s612_s30, 128, %s620_s5, %s151_s7  }
  0x26   : > { %p697_p1 = scmp.lt.s32.totalorder %s531_s17, 3  ;;  %p698_p5 = scmp.ge.s32.totalorder %s531_s17, 1 }
  0x28   : > { %p168_p13 = pnand %p698_p5, %p697_p1 }
  0x29   : > { %s173_s26 = sand.u32 (!%p168_p13), 1, %s515_s13  }
  0x2a   : > { %171 = sbr.rel (%p168_p13) target bundleno = 276 (0x114), region = 32  ;;  %s373_s27 = sshll.u32 (!%p168_p13), %s173_s26, 3 }
  0x2b   : > { %s174_s28 = scalar_lea.sflag (!%p168_p13), [#allocation3], %s173_s26  ;;  %s177_s29 = scalar_lea.vmem (!%p168_p13), [#allocation2], %s373_s27 }
  0x31   : > { %506 = dma.done.wait (%p599_p7), %s174_s28, 128  }
  0x32   : > { %508 = vsyncadd (%p599_p7), %s174_s28, 4294967168  ;;  %v534_v0 = vmov 0.0   ;;  %vm535_vm0 = vmmov 0   ;;  %v449_v1 = vld [vmem:[%s691_s1] sm:$0xff]   ;;  %v450_v2 = vld [vmem:[%s691_s1 + $0x8] sm:$0xff]   ;;  %vm235_vm1 = vcmask 261120  }
  0x33   : > { %384 = vmatprep.subr.bf16.mxu0 %v534_v0  ;;  %388 = vmatprep.mubr.msk.bf16.mxu0 %vm535_vm0, %v534_v0  ;;  %v210_v3 = vld [vmem:[%s177_s29] sm:$0xff]  ;;  %p202_p7 = scmp.lt.s32.totalorder %s523_s15, 1  ;;  %v375_v5 = vld [vmem:[%s692_s2] ss:$0 sm:$0xff]  ;;  %vm280_vm2 = vcmask 257024  }
  0x34   : > { %385 = vmatpush3.bf16.msra.mxu0 %v449_v1  ;;  %v211_v4 = vpack.c.bf16 %v210_v3, %v210_v3 }
  0x35   : > { %386 = vmatprep.subr.bf16.mxu0 %v534_v0  ;;  %s707_s15 = smov (!%p202_p7, %s523_s15), 1 }
  0x36   : > { %s374_s8 = sshll.u32 %s707_s15, 2 }
  0x37   : > { %s208_s11 = scalar_lea.vmem %s693_s3, %s374_s8 }
  0x38   : > { %387 = vmatpush3.bf16.msra.mxu0 %v450_v2 }
  0x3b   : > { %389 = vmatmul.mubr.msk.bf16.vlgmr.msra.gmra.mrb[0].mxu0 %vm235_vm1, %v211_v4 }
 0x10e   : > { %v273_v6 = vpop.f32.mrb[0].mxu0 }
 0x10f   : > { %v274_v7 = vadd.f32 %v375_v5, %v273_v6  ;;  %v390_v8 = vpop.f32.mrb[1].mxu0 }
 0x110   : > { %v276_v9 = vpop.f32.mrb[2].mxu0 }
 0x111   : > { %v279_v10 = vpack.c.bf16 %v274_v7, %v274_v7  ;;  %v391_v11 = vpop.f32.mrb[3].mxu0 }
 0x113   : > { %281 = vst.msk [vmem:[%s208_s11] sm:$0xf] %vm280_vm2, %v279_v10 }
 0x114 PF: > { %s16_s17 = sadd.s32 1, %s531_s17   ;;  %s699_s12 = smov %s515_s13 }
 0x115   : > { %p13_p9 = scmp.ge.s32.totalorder %s16_s17, 4   ;;  %s700_s13 = smov %s519_s14 }
 0x116   : > { %s701_s14 = smov %s605_s24  ;;  %s702_s15 = smov %s527_s16 }
 0x117   : > { %s703_s16 = smov %s705_s19  ;;  %15 = sbr.rel (!%p13_p9) target bundleno = 4 (0x4), region = 72 }
 0x11e   :  { %307 = vsyncpa [#allocation3], 1 }
 0x11f   :  { %309 = vsyncpa [#allocation3 + $0x1], 1 }

// kernel: multi_head_attention.6
= control target key start
LH: loop header
LB: loop body
LE: loop exit
PB: predicated region body
PF: predicated region fallthrough
CT: control target
= control target key end

     0   :  { %s442_s12 = smov 0   ;;  %s444_s13 = smov 0   ;;  %s484_s0 = inlined_call_operand.vmem [shape: f32[2,8,32], index: 0, kind: input, shape index: {}]   ;;  %s485_s1 = inlined_call_operand.vmem [shape: bf16[32,32], index: 1, kind: input, shape index: {}]   ;;  %s486_s2 = inlined_call_operand.vmem [shape: f32[1,32], index: 2, kind: input, shape index: {}]   ;;  %s487_s3 = inlined_call_operand.vmem [shape: bf16[2,8,32], index: 3, kind: output, shape index: {}]  }
   0x1   :  { %s446_s14 = smov 0  }
   0x2 LB: > { %s25_s15 = sadd.s32 1, %s414_s13  ;;  %p348_p0 = scmp.ge.s32.totalorder %s418_s14, 1  ;;  %s418_s14 = sphi %s446_s14, %s13_s14   ;;  %s414_s13 = sphi %s444_s13, %s489_s13   ;;  %s410_s12 = sphi %s442_s12, %s488_s12  }
   0x3   : > { %p27_p1 = scmp.ge.s32.totalorder %s25_s15, 2  ;;  %p155_p2 = scmp.lt.s32.totalorder %s418_s14, 3 }
   0x5   : > { %s491_s15 = smov (%p27_p1, %s25_s15), 0  ;;  %p156_p3 = pnand %p348_p0, %p155_p2 }
   0x6   : > { %v394_v0 = vld [vmem:[%s485_s1] sm:$0xff] (!%p156_p3)   ;;  %v420_v1 = vmov (!%p156_p3), 0.0   ;;  %v395_v2 = vld [vmem:[%s485_s1 + $0x8] sm:$0xff] (!%p156_p3)   ;;  %vm421_vm0 = vmmov (!%p156_p3), 0   ;;  %p183_p4 = scmp.lt.s32.totalorder (!%p156_p3), %s410_s12, 1  ;;  %vm223_vm1 = vcmask (!%p156_p3), 261120  }
   0x7   : > { %159 = sbr.rel (%p156_p3) target bundleno = 237 (0xed), region = 32  ;;  %360 = vmatprep.subr.bf16.mxu0 (!%p156_p3), %v420_v1  ;;  %364 = vmatprep.mubr.msk.bf16.mxu0 (!%p156_p3), %vm421_vm0, %v420_v1  ;;  %v351_v5 = vld [vmem:[%s486_s2] ss:$0 sm:$0xff] (!%p156_p3)  ;;  %vm268_vm2 = vcmask (!%p156_p3), 257024  }
   0x8   : > { %361 = vmatpush3.bf16.msra.mxu0 (!%p156_p3), %v394_v0 }
   0x9   : > { %362 = vmatprep.subr.bf16.mxu0 (!%p156_p3), %v420_v1 }
   0xc   : > { %363 = vmatpush3.bf16.msra.mxu0 (!%p156_p3), %v395_v2 }
   0xe   : > { %s493_s12 = smov (!%p183_p4, %s410_s12), 1 }
   0xf   : > { %s349_s20 = sshll.u32 %s493_s12, 3  ;;  %s350_s26 = sshll.u32 %s493_s12, 2 }
  0x10   : > { %s189_s23 = scalar_lea.vmem %s484_s0, %s349_s20  ;;  %s196_s29 = scalar_lea.vmem %s487_s3, %s350_s26 }
  0x11   : > { %v198_v3 = vld [vmem:[%s189_s23] sm:$0xff] }
  0x12   : > { %v199_v4 = vpack.c.bf16 %v198_v3, %v198_v3 }
  0x14   : > { %365 = vmatmul.mubr.msk.bf16.vlgmr.msra.gmra.mrb[0].mxu0 %vm223_vm1, %v199_v4 }
  0xe7   : > { %v261_v6 = vpop.f32.mrb[0].mxu0 }
  0xe8   : > { %v262_v7 = vadd.f32 %v351_v5, %v261_v6  ;;  %v366_v8 = vpop.f32.mrb[1].mxu0 }
  0xe9   : > { %v264_v9 = vpop.f32.mrb[2].mxu0 }
  0xea   : > { %v267_v10 = vpack.c.bf16 %v262_v7, %v262_v7  ;;  %v367_v11 = vpop.f32.mrb[3].mxu0 }
  0xec   : > { %269 = vst.msk [vmem:[%s196_s29] sm:$0xf] %vm268_vm2, %v267_v10 }
  0xed PF: > { %s13_s14 = sadd.s32 1, %s418_s14   ;;  %s488_s12 = smov %s414_s13 }
  0xee   : > { %p10_p5 = scmp.ge.s32.totalorder %s13_s14, 4   ;;  %s489_s13 = smov %s491_s15 }
  0xf0   :  { %12 = sbr.rel (!%p10_p5) target bundleno = 2 (0x2), region = 62 }

// kernel: multi_head_attention.8
= control target key start
LH: loop header
LB: loop body
LE: loop exit
PB: predicated region body
PF: predicated region fallthrough
CT: control target
= control target key end

     0   :  { %s637_s12 = smov 0   ;;  %s639_s13 = smov 0   ;;  %s693_s0 = inlined_call_operand.vmem [shape: bf16[8,8,8], index: 0, kind: input, shape index: {}]   ;;  %s694_s1 = inlined_call_operand.vmem [shape: bf16[8,8,8], index: 1, kind: input, shape index: {}]   ;;  %s695_s2 = inlined_call_operand.vmem [shape: bf16[8,8,8], index: 2, kind: input, shape index: {}]   ;;  %s696_s3 = inlined_call_operand.vmem [shape: bf16[8,8,8], index: 3, kind: output, shape index: {}]  }
   0x1   :  { %s641_s14 = smov 0  }
   0x2 LB: > { %s32_s15 = sadd.s32 1, %s607_s13  ;;  %p528_p0 = scmp.ge.s32.totalorder %s611_s14, 1  ;;  %s611_s14 = sphi %s641_s14, %s13_s14   ;;  %s607_s13 = sphi %s639_s13, %s698_s13   ;;  %s603_s12 = sphi %s637_s12, %s697_s12  }
   0x3   : > { %p34_p1 = scmp.ge.s32.totalorder %s32_s15, 8  ;;  %p190_p2 = scmp.lt.s32.totalorder %s611_s14, 9 }
   0x5   : > { %s700_s15 = smov (%p34_p1, %s32_s15), 0  ;;  %p191_p3 = pnand %p528_p0, %p190_p2 }
   0x6   : > { %p232_p4 = scmp.lt.s32.totalorder (!%p191_p3), %s603_s12, 7  ;;  %vm268_vm0 = vcmask (!%p191_p3), 64512   ;;  %v613_v0 = vmov (!%p191_p3), 0.0   ;;  %vm614_vm1 = vmmov (!%p191_p3), 0   ;;  %vm265_vm2 = vcmask (!%p191_p3), 7168  }
   0x7   : > { %194 = sbr.rel (%p191_p3) target bundleno = 823 (0x337), region = 32  ;;  %541 = vmatprep.subr.bf16.mxu0 (!%p191_p3), %v613_v0  ;;  %269 = vst.msk [vmem:[#allocation4] sm:$0xff] (!%p191_p3), %vm268_vm0, %v613_v0  ;;  %543 = vmatprep.mubr.msk.bf16.mxu0 (!%p191_p3), %vm614_vm1, %v613_v0  ;;  %v615_v4 = vmov (!%p191_p3), -inf   ;;  %v616_v10 = vmov (!%p191_p3), 0   ;;  %vm355_vm3 = vcmask (!%p191_p3), 1043456   ;;  %vm415_vm4 = vcmask (!%p191_p3), 60416  }
   0x8   : > { %547 = vmatprep.subr.bf16.mxu1 (!%p191_p3), %v613_v0  ;;  %549 = vmatprep.mubr.msk.bf16.mxu1 (!%p191_p3), %vm614_vm1, %v613_v0  ;;  %266 = vst.msk [vmem:[#allocation2] sm:$0xff] (!%p191_p3), %vm265_vm2, %v615_v4  ;;  %267 = vst.msk [vmem:[#allocation3] sm:$0xff] (!%p191_p3), %vm265_vm2, %v613_v0 }
   0x9   : > { %581 = vset.pattern.permute.xlu0 (!%p191_p3), %v616_v10  ;;  %582 = vset.pattern.permute.xlu1 (!%p191_p3), %v616_v10 }
   0xe   : > { %s702_s12 = smov (!%p232_p4, %s603_s12), 7  ;;  %v343_v31 = vld [vmem:[#allocation4] sm:$0xff] }
   0xf   : > { %s656_s16 = sshll.u32 %s702_s12, 2  ;;  %v319_v11 = vld [vmem:[#allocation2] sm:$0xff]  ;;  %v335_v25 = vld [vmem:[#allocation3] sm:$0xff] }
  0x10   : > { %s245_s19 = scalar_lea.vmem %s694_s1, %s656_s16  ;;  %s238_s22 = scalar_lea.vmem %s693_s0, %s656_s16 }
  0x11   : > { %v271_v1 = vld [vmem:[%s245_s19] sm:$0xf]  ;;  %s252_s25 = scalar_lea.vmem %s695_s2, %s656_s16  ;;  %s259_s28 = scalar_lea.vmem %s696_s3, %s656_s16 }
  0x12   : > { %v277_v2 = vsel %vm268_vm0, %v271_v1, 0  ;;  %v270_v3 = vld [vmem:[%s238_s22] sm:$0xf] }
  0x13   : > { %542 = vmatpush3.bf16.xpose.msra.mxu0 %v277_v2  ;;  %v351_v15 = vld [vmem:[%s252_s25] sm:$0xf] }
  0x14   : > { %v357_v16 = vsel %vm355_vm3, %v351_v15, 0 }
  0x15   : > { %548 = vmatpush3.bf16.msra.mxu1 %v357_v16 }
  0x1a   : > { %544 = vmatmul.mubr.msk.bf16.vlgmr.msra.gmra.mrb[0].mxu0 %vm268_vm0, %v270_v3 }
  0xed   : > { %v313_v5 = vpop.f32.mrb[0].mxu0 }
  0xee   : > { %v545_v6 = vpop.f32.mrb[1].mxu0  ;;  %v320_v7 = vsel %vm268_vm0, %v313_v5, -inf }
  0xef   : > { %321 = vmax.xlane.f32.xlu0 %v320_v7  ;;  %v316_v8 = vpop.f32.mrb[2].mxu0 }
  0xf0   : > { %v546_v9 = vpop.f32.mrb[3].mxu0 }
 0x17c   : > { %v322_v12 = vpop.xlane.xlu0 %321 }
 0x17d   : > { %v323_v13 = vmax.f32 %v319_v11, %v322_v12 }
 0x17f   : > { %v324_v14 = vsub.f32 %v319_v11, %v323_v13  ;;  %401 = vst.msk [vmem:[#allocation2] sm:$0xff] %vm265_vm2, %v323_v13  ;;  %329 = vperm.xlu0 %581, %v323_v13  }
 0x181   : > { %v325_v23 = vmul.f32 1.442695, %v324_v14 }
 0x1fe   : > { %v330_v17 = vpop.permute.xlu0 %329 }
 0x1ff   : > { %v332_v18 = vsub.f32 %v313_v5, %v330_v17 }
 0x201   : > { %v333_v19 = vmul.f32 1.442695, %v332_v18 }
 0x203   : > { %583 = vpow2.f32 %v333_v19 }
 0x204   : > { %585 = vpow2.f32 %v325_v23 }
 0x20d   : > { %v584_v20 = vpop.eup %583 }
 0x20e   : > { %v337_v21 = vsel %vm268_vm0, %v584_v20, 0.0  ;;  %v350_v22 = vpack.c.bf16 %v584_v20, %v584_v20  ;;  %v586_v24 = vpop.eup %585 }
 0x20f   : > { %338 = vadd.xlane.f32.xlu1 %v337_v21  ;;  %v336_v26 = vmul.f32 %v586_v24, %v335_v25 }
 0x210   : > { %550 = vmatmul.mubr.msk.bf16.vlgmr.msra.gmra.mrb[0].mxu1 %vm268_vm0, %v350_v22 }
 0x220   : > { %346 = vperm.xlu1 %582, %v586_v24  }
 0x29c   : > { %v339_v27 = vpop.xlane.xlu1 %338 }
 0x29d   : > { %v340_v28 = vadd.f32 %v339_v27, %v336_v26 }
 0x29f   : > { %342 = vst.msk [vmem:[#allocation3] sm:$0xff] %vm265_vm2, %v340_v28 }
 0x2a0   : > { %v347_v32 = vpop.permute.xlu1 %346 }
 0x2a1   : > { %v349_v33 = vmul.f32 %v347_v32, %v343_v31 }
 0x2a6   : > { %v405_v29 = vld [vmem:[#allocation3] sm:$0xff] }
 0x2a7   : > { %587 = vrcp.f32 %v405_v29 }
 0x2b1   : > { %v588_v30 = vpop.eup %587 }
 0x2b2   : > { %410 = vperm.xlu1 %582, %v588_v30  }
 0x2e3   : > { %v393_v34 = vpop.f32.mrb[0].mxu1 }
 0x2e4   : > { %v399_v35 = vadd.f32 %v393_v34, %v349_v33  ;;  %v551_v36 = vpop.f32.mrb[1].mxu1 }
 0x2e5   : > { %v396_v37 = vpop.f32.mrb[2].mxu1 }
 0x2e6   : > { %400 = vst.msk [vmem:[#allocation4] sm:$0xff] %vm268_vm0, %v399_v35  ;;  %v552_v38 = vpop.f32.mrb[3].mxu1 }
 0x2ed   : > { %v407_v39 = vld [vmem:[#allocation4] sm:$0xff] }
 0x331   : > { %v411_v40 = vpop.permute.xlu1 %410 }
 0x332   : > { %v413_v41 = vmul.f32 %v411_v40, %v407_v39 }
 0x334   : > { %v414_v42 = vpack.c.bf16 %v413_v41, %v413_v41 }
 0x336   : > { %416 = vst.msk [vmem:[%s259_s28] sm:$0xf] %vm415_vm4, %v414_v42 }
 0x337 PF: > { %s13_s14 = sadd.s32 1, %s611_s14   ;;  %s697_s12 = smov %s607_s13 }
 0x338   : > { %p10_p5 = scmp.ge.s32.totalorder %s13_s14, 10   ;;  %s698_s13 = smov %s700_s15 }
 0x33a   :  { %12 = sbr.rel (!%p10_p5) target bundleno = 2 (0x2), region = 76 }

// kernel: multi_head_attention.9
= control target key start
LH: loop header
LB: loop body
LE: loop exit
PB: predicated region body
PF: predicated region fallthrough
CT: control target
= control target key end

     0   :  { %8 = vsyncpa [#allocation3], 0  ;;  %s658_s0 = inlined_call_operand.vmem [shape: bf16[2,8,32], index: 0, kind: input, shape index: {}]   ;;  %s659_s1 = inlined_call_operand.vmem [shape: bf16[32,32], index: 1, kind: input, shape index: {}]   ;;  %s660_s2 = inlined_call_operand.vmem [shape: f32[1,32], index: 2, kind: input, shape index: {}]   ;;  %s661_s3 = inlined_call_operand.hbm [shape: f32[2,8,32], index: 3, kind: output, shape index: {}]  }
   0x1   :  { %10 = vsyncpa [#allocation3 + $0x1], 0  ;;  %s535_s12 = smov 0   ;;  %s537_s13 = smov 0  }
   0x2   :  { %s539_s14 = smov 0   ;;  %s541_s15 = smov 0  }
   0x3   :  { %s543_s16 = smov 0   ;;  %s545_s17 = smov 0  }
   0x4 LB: > { %s347_s18 = sadd.s32 4294967295, %s510_s17   ;;  %s348_s19 = sadd.s32 4294967294, %s510_s17   ;;  %s510_s17 = sphi %s545_s17, %s16_s17   ;;  %s506_s16 = sphi %s543_s16, %s668_s16   ;;  %s502_s15 = sphi %s541_s15, %s667_s15   ;;  %s498_s14 = sphi %s539_s14, %s666_s14   ;;  %s494_s13 = sphi %s537_s13, %s665_s13   ;;  %s490_s12 = sphi %s535_s12, %s664_s12  }
   0x5   : > { %s28_s20 = sadd.s32 1, %s506_s16  ;;  %s107_s21 = sadd.s32 1, %s498_s14 }
   0x6   : > { %p30_p0 = scmp.ge.s32.totalorder %s28_s20, 2  ;;  %p117_p1 = scmp.ne.s32.totalorder %s498_s14, %s494_s13 }
   0x7   : > { %p118_p2 = scmp.eq.s32.totalorder %s347_s18, 1  ;;  %p123_p3 = scmp.ne.s32.totalorder %s494_s13, %s490_s12 }
   0x8   : > { %s670_s20 = smov (%p30_p0, %s28_s20), 0  ;;  %p124_p5 = scmp.eq.s32.totalorder %s348_s19, 1 }
   0x9   : > { %p575_p4 = por %p118_p2, %p117_p1  ;;  %s102_s23 = ssub.s32 %s506_s16, %s670_s20 }
   0xa   : > { %p351_p6 = scmp.ge.s32.totalorder %s510_s17, 1  ;;  %p105_p7 = scmp.eq.s32.totalorder %s102_s23, 0 }
   0xb   : > { %p582_p8 = por %p124_p5, %p123_p3  ;;  %p158_p9 = scmp.lt.s32.totalorder %s510_s17, 3 }
   0xc   : > { %s588_s25 = scalar_select %p105_p7, %s498_s14, %s107_s21  }
   0xd   : > { %p159_p10 = pnand %p351_p6, %p158_p9 }
   0xe   : > { %v430_v0 = vld [vmem:[%s659_s1] sm:$0xff] (!%p159_p10)   ;;  %v512_v1 = vmov (!%p159_p10), 0.0   ;;  %v431_v2 = vld [vmem:[%s659_s1 + $0x8] sm:$0xff] (!%p159_p10)   ;;  %vm513_vm0 = vmmov (!%p159_p10), 0   ;;  %p184_p11 = scmp.lt.s32.totalorder (!%p159_p10), %s502_s15, 1  ;;  %vm216_vm1 = vcmask (!%p159_p10), 261120  }
   0xf   : > { %162 = sbr.rel (%p159_p10) target bundleno = 255 (0xff), region = 32  ;;  %365 = vmatprep.subr.bf16.mxu0 (!%p159_p10), %v512_v1  ;;  %369 = vmatprep.mubr.msk.bf16.mxu0 (!%p159_p10), %vm513_vm0, %v512_v1  ;;  %s181_s8 = sand.u32 (!%p159_p10), 1, %s494_s13   ;;  %v354_v4 = vld [vmem:[%s660_s2] ss:$0 sm:$0xff] (!%p159_p10) }
  0x10   : > { %366 = vmatpush3.bf16.msra.mxu0 (!%p159_p10), %v430_v0  ;;  %s352_s9 = sshll.u32 (!%p159_p10), %s181_s8, 3  ;;  %s359_s18 = sshll.u32 (!%p159_p10), %s502_s15, 7 }
  0x11   : > { %367 = vmatprep.subr.bf16.mxu0 (!%p159_p10), %v512_v1  ;;  %s183_s19 = scalar_lea.vmem (!%p159_p10), [#allocation2], %s352_s9  ;;  %s610_s27 = scalar_lea.hbm (!%p159_p10), %s661_s3, %s359_s18 }
  0x12   : > { %s276_s21 = sshll.u32 (!%p159_p10), %s183_s19, 4  ;;  %s514_s29 = smov (!%p159_p10), [#allocation2]   ;;  %s612_s21 = int_to_ptr.vmem [resolvable:$true] %s276_s21 }
  0x13   : > { %s432_s28 = scalar_lea.vmem (!%p159_p10), %s612_s21, 128 }
  0x14   : > { %368 = vmatpush3.bf16.msra.mxu0 (!%p159_p10), %v431_v2  ;;  %p433_p12 = scmp.ne.s32.totalorder (!%p159_p10), %s612_s21, %s432_s28 }
  0x16   : > { %s185_s30 = scalar_select %p184_p11, %s502_s15, 1 }
  0x17   : > { %s262_s15 = scalar_lea.sflag [#allocation3], %s181_s8  ;;  %p434_p13 = pnand %p433_p12, %p575_p4 }
  0x18   : > { %s353_s4 = sshll.u32 %s185_s30, 2  ;;  %s436_s30 = sshll.u32 %s514_s29, 4  ;;  %s437_s30 = int_to_ptr.vmem [resolvable:$false] %s436_s30 }
  0x19   : > { %s190_s7 = scalar_lea.vmem %s658_s0, %s353_s4  ;;  %p435_p0 = pneg %p434_p13 }
  0x1a   : > { %v192_v3 = vld [vmem:[%s190_s7] sm:$0xf]  ;;  %s438_s4 = scalar_lea.vmem %s437_s30, 256  ;;  %p439_p1 = scmp.lt.s32.totalorder %s612_s21, %s437_s30 }
  0x1b   : > { %370 = vmatmul.mubr.msk.bf16.vlgmr.msra.gmra.mrb[0].mxu0 %vm216_vm1, %v192_v3  ;;  %p440_p2 = scmp.lt.s32.totalorder %s438_s4, %s432_s28 }
  0x1d   : > { %p441_p3 = por %p440_p2, %p439_p1 }
  0x1f   : > { %p442_p5 = pnand %p441_p3, %p435_p0 }
  0xee   : > { %v254_v5 = vpop.f32.mrb[0].mxu0 }
  0xef   : > { %v255_v6 = vadd.f32 %v354_v4, %v254_v5  ;;  %v371_v7 = vpop.f32.mrb[1].mxu0 }
  0xf0   : > { %v257_v8 = vpop.f32.mrb[2].mxu0 }
  0xf1   : > { %v372_v9 = vpop.f32.mrb[3].mxu0  ;;  %260 = vst.msk [vmem:[%s183_s19] sm:$0xff] %vm216_vm1, %v255_v6 }
  0xf2   : > { %445 = shalt.err (!%p442_p5)
}
  0xf3   : > { %s446_s5 = scalar_lea.hbm %s610_s27, 128  ;;  %s450_s8 = scalar_lea.hbm %s661_s3, 256 }
  0xf4   : > { %p447_p6 = scmp.ne.s32.totalorder %s610_s27, %s446_s5  ;;  %p451_p10 = scmp.lt.u32.totalorder %s610_s27, %s661_s3 }
  0xf5   : > { %p452_p11 = scmp.lt.u32.totalorder %s450_s8, %s446_s5  ;;  %p454_p13 = scmp.lt.u32.totalorder %s446_s5, %s610_s27 }
  0xf6   : > { %p448_p7 = pnand %p447_p6, %p575_p4 }
  0xf7   : > { %p453_p12 = por %p452_p11, %p451_p10 }
  0xf8   : > { %p449_p9 = pneg %p448_p7 }
  0xf9   : > { %p455_p0 = por %p454_p13, %p453_p12 }
  0xfb   : > { %p456_p1 = pnand %p455_p0, %p449_p9 }
  0xfd   : > { %459 = shalt.err (!%p456_p1)
}
  0xfe   : > { %373 = dma.vmem_to_hbm [thread:$0]  (%p575_p4), %s612_s21, 128, %s610_s27, %s262_s15  }
  0xff PF: > { %p379_p2 = scmp.ge.s32.totalorder %s510_s17, 2  ;;  %s288_s11 = sand.u32 1, %s490_s12  }
 0x100   : > { %s289_s18 = scalar_lea.sflag [#allocation3], %s288_s11 }
 0x101   : > { %p376_p3 = pnand %p379_p2, %p582_p8 }
 0x103   : > { %485 = dma.done.wait (!%p376_p3), %s289_s18, 128  }
 0x104   : > { %487 = vsyncadd (!%p376_p3), %s289_s18, 4294967168  ;;  %s16_s17 = sadd.s32 1, %s510_s17   ;;  %s664_s12 = smov %s494_s13 }
 0x105   : > { %p13_p5 = scmp.ge.s32.totalorder %s16_s17, 4   ;;  %s665_s13 = smov %s498_s14 }
 0x106   : > { %s666_s14 = smov %s588_s25  ;;  %s667_s15 = smov %s506_s16 }
 0x107   : > { %s668_s16 = smov %s670_s20  ;;  %15 = sbr.rel (!%p13_p5) target bundleno = 4 (0x4), region = 67 }
 0x10e   :  { %294 = vsyncpa [#allocation3], 1 }
 0x10f   :  { %296 = vsyncpa [#allocation3 + $0x1], 1 }

</bundles_post_ra>
